<compile_context>
chip_gen: v7x
topology: tpu7x:2x2x1
jax: 0.10.0
libtpu: 0.0.40
codegen_flags: <defaults>
</compile_context>

<pallas_src>
import jax
import jax.numpy as jnp
from jax.experimental import pallas as pl
from jax.experimental.pallas import tpu as pltpu

_LANE = 128
_SUBLANE = 8


def _round_up(n, m):
    return ((n + m - 1) // m) * m


def _mlp_kernel(x_ref, w1_ref, b1_ref, w2_ref, b2_ref, o_ref):
    # x tile arrives as f32 straight from HBM; cast to bf16 on the VPU, MXU dot with
    # f32 accumulation (K = D = 104 is handled by Mosaic's internal padding).
    x = x_ref[...].astype(jnp.bfloat16)
    h = jnp.dot(x, w1_ref[...], preferred_element_type=jnp.float32)
    # bias + ReLU on the VPU in f32 (padded hidden columns are exactly zero).
    h = jnp.maximum(h + b1_ref[...], 0.0)
    # dropout1: identity in eval/inference mode.
    # TODO(synk): training-mode dropout (random mask scaled by 1/(1-p)) not implemented here.
    # layer_2 (H -> 1): broadcast-multiply + lane reduction (VPU/XLU), no second MXU round-trip.
    z = jnp.sum(h * w2_ref[...], axis=-1, keepdims=True) + b2_ref[0, 0]
    # Numerically stable sigmoid on the EUP; store a single real column (no lane padding).
    o_ref[...] = jax.nn.sigmoid(z).astype(o_ref.dtype)


def prepare_simple_mlp_params(w1, b1, w2, b2):
    """One-time weight prep (pad H to lane width, cast w1 to bf16). Hoisted out of the hot path."""
    D, H = w1.shape
    assert w2.shape == (H, 1), "SimpleMLP output_dim is 1"
    h_pad = _round_up(H, _LANE)
    w1p = jnp.zeros((D, h_pad), jnp.bfloat16).at[:, :H].set(w1.astype(jnp.bfloat16))
    b1p = jnp.zeros((1, h_pad), jnp.float32).at[:, :H].set(b1.astype(jnp.float32).reshape(1, H))
    w2p = jnp.zeros((1, h_pad), jnp.float32).at[:, :H].set(w2.astype(jnp.float32)[:, 0][None, :])
    b2s = b2.astype(jnp.float32).reshape(1, 1)
    return (w1p, b1p, w2p, b2s)


def simple_mlp_forward(x, params, *, block_b=4096):
    """x: [B, D] f32, params from prepare_simple_mlp_params -> [B, 1] f32 probabilities."""
    w1p, b1p, w2p, b2s = params
    B, D = x.shape
    assert w1p.shape[0] == D
    h_pad = w1p.shape[1]

    # Batch tile: multiple of 8 sublanes, clamped to the (rounded-up) batch; large default
    # amortizes the ~0.35 us per-grid-step overhead. Partial trailing tiles are masked by Pallas.
    block_b = max(_SUBLANE, min(_round_up(block_b, _SUBLANE), _round_up(B, _SUBLANE)))
    grid = (pl.cdiv(B, block_b),)

    cost = pl.CostEstimate(
        flops=2 * B * D * h_pad + 3 * B * h_pad,
        transcendentals=B,
        bytes_accessed=(x.size * 4 + w1p.size * 2 + b1p.size * 4 + w2p.size * 4 + 4 + B * 4),
    )

    out = pl.pallas_call(
        _mlp_kernel,
        out_shape=jax.ShapeDtypeStruct((B, 1), jnp.float32),
        grid_spec=pltpu.PrefetchScalarGridSpec(
            num_scalar_prefetch=0,
            grid=grid,
            in_specs=[
                # x tile, pipelined over the batch grid; f32 straight from HBM, full D extent.
                pl.BlockSpec((block_b, D), lambda i: (i, 0)),
                pl.BlockSpec((D, h_pad), lambda i: (0, 0)),          # w1: resident (bf16)
                pl.BlockSpec((1, h_pad), lambda i: (0, 0)),          # b1: resident
                pl.BlockSpec((1, h_pad), lambda i: (0, 0)),          # w2 row: resident
                pl.BlockSpec(memory_space=pltpu.MemorySpace.SMEM),   # b2 scalar in SMEM
            ],
            # Single real output column -> 4 B/row HBM writeback (no 128x slab amplification).
            out_specs=pl.BlockSpec((block_b, 1), lambda i: (i, 0)),
        ),
        compiler_params=pltpu.CompilerParams(
            dimension_semantics=("parallel",),  # shards batch tiles across v7x's 2 TCs
        ),
        cost_estimate=cost,
    )(x, w1p, b1p, w2p, b2s)

    return out


if __name__ == "__main__":
    # Shapes implied by the module: input_dim = 100 (word2vec) + a few scaled numeric cols,
    # hidden_units, output_dim = 1. Keep them small.
    B = 8            # batch
    INPUT_DIM = 104  # 100 w2v dims + 4 scaled numerical columns
    HIDDEN = 32
    OUT = 1

    key = jax.random.PRNGKey(0)
    kx, k1, k2, k3, k4 = jax.random.split(key, 5)

    # Deterministic param init mimicking nn.Linear default: U(-1/sqrt(fan_in), 1/sqrt(fan_in))
    bound1 = 1.0 / jnp.sqrt(INPUT_DIM)
    w1 = jax.random.uniform(k1, (INPUT_DIM, HIDDEN), jnp.float32, -bound1, bound1)
    b1 = jax.random.uniform(k2, (1, HIDDEN), jnp.float32, -bound1, bound1)
    bound2 = 1.0 / jnp.sqrt(HIDDEN)
    w2 = jax.random.uniform(k3, (HIDDEN, OUT), jnp.float32, -bound2, bound2)
    b2 = jax.random.uniform(k4, (1, OUT), jnp.float32, -bound2, bound2)

    x = jax.random.normal(kx, (B, INPUT_DIM), jnp.float32)

    params = prepare_simple_mlp_params(w1, b1, w2, b2)   # one-time prep (hoisted)
    out = simple_mlp_forward(x, params)
    out = jax.block_until_ready(out)

    # Reference with the same bf16-operand / f32-accumulate first matmul.
    h_ref = jnp.dot(
        x.astype(jnp.bfloat16), w1.astype(jnp.bfloat16),
        preferred_element_type=jnp.float32,
    ) + b1
    ref = jax.nn.sigmoid(jnp.maximum(h_ref, 0.0) @ w2 + b2)

    assert out.shape == (B, OUT)
    assert jnp.allclose(out, ref, atol=1e-4, rtol=1e-4)

    print("KERNEL_OK")
</pallas_src>

<mosaic_0001>
module attributes {stable_mosaic.version = 11 : i64} {
  func.func @_mlp_kernel(%arg0: i32, %arg1: memref<8x104xf32, #tpu.memory_space<vmem>>, %arg2: memref<104x128xbf16, #tpu.memory_space<vmem>>, %arg3: memref<1x128xf32, #tpu.memory_space<vmem>>, %arg4: memref<1x128xf32, #tpu.memory_space<vmem>>, %arg5: memref<1x1xf32, #tpu.memory_space<smem>>, %arg6: memref<8x1xf32, #tpu.memory_space<vmem>>) attributes {dimension_semantics = [#tpu.dimension_semantics<parallel>], iteration_bounds = array<i64: 1>, scalar_prefetch = 0 : i64, scratch_operands = 0 : i64, tpu.core_type = #tpu.core_type<tc>, window_params = [{transform_indices = @transform_0, window_bounds = array<i64: 8, 104>}, {pipeline_mode = #tpu.pipeline_mode<synchronous>, transform_indices = @transform_1, window_bounds = array<i64: 104, 128>}, {pipeline_mode = #tpu.pipeline_mode<synchronous>, transform_indices = @transform_2, window_bounds = array<i64: 1, 128>}, {pipeline_mode = #tpu.pipeline_mode<synchronous>, transform_indices = @transform_3, window_bounds = array<i64: 1, 128>}, {transform_indices = @transform_4, window_bounds = array<i64: 1, 1>}, {transform_indices = @transform_5, window_bounds = array<i64: 8, 1>}]} {
    %c0 = arith.constant 0 : index
    %c0_0 = arith.constant 0 : index
    %0 = vector.load %arg1[%c0, %c0_0] : memref<8x104xf32, #tpu.memory_space<vmem>>, vector<8x104xf32>
    %1 = arith.truncf %0 : vector<8x104xf32> to vector<8x104xbf16>
    %c0_1 = arith.constant 0 : index
    %c0_2 = arith.constant 0 : index
    %2 = vector.load %arg2[%c0_1, %c0_2] : memref<104x128xbf16, #tpu.memory_space<vmem>>, vector<104x128xbf16>
    %cst = arith.constant dense<0.000000e+00> : vector<8x128xf32>
    %3 = tpu.matmul %1, %2, %cst {dimension_numbers = #tpu.dot_dimension_numbers<[1], [0], [0], [1], [0, 0, 1, 1], [], []>} : vector<8x104xbf16>, vector<104x128xbf16>, vector<8x128xf32> -> vector<8x128xf32>
    %c0_3 = arith.constant 0 : index
    %c0_4 = arith.constant 0 : index
    %4 = vector.load %arg3[%c0_3, %c0_4] : memref<1x128xf32, #tpu.memory_space<vmem>>, vector<1x128xf32>
    %5 = vector.broadcast %4 : vector<1x128xf32> to vector<8x128xf32>
    %6 = arith.addf %3, %5 : vector<8x128xf32>
    %cst_5 = arith.constant 0.000000e+00 : f32
    %7 = vector.broadcast %cst_5 : f32 to vector<8x128xf32>
    %8 = arith.maximumf %6, %7 : vector<8x128xf32>
    %c0_6 = arith.constant 0 : index
    %c0_7 = arith.constant 0 : index
    %9 = vector.load %arg4[%c0_6, %c0_7] : memref<1x128xf32, #tpu.memory_space<vmem>>, vector<1x128xf32>
    %10 = vector.broadcast %9 : vector<1x128xf32> to vector<8x128xf32>
    %11 = arith.mulf %8, %10 : vector<8x128xf32>
    %cst_8 = arith.constant dense<0.000000e+00> : vector<8xf32>
    %12 = vector.multi_reduction <add>, %11, %cst_8 [1] : vector<8x128xf32> to vector<8xf32>
    %13 = vector.shape_cast %12 : vector<8xf32> to vector<8x1xf32>
    %c0_9 = arith.constant 0 : index
    %c0_10 = arith.constant 0 : index
    %14 = memref.load %arg5[%c0_9, %c0_10] : memref<1x1xf32, #tpu.memory_space<smem>>
    %15 = vector.broadcast %14 : f32 to vector<8x1xf32>
    %16 = arith.addf %13, %15 : vector<8x1xf32>
    %17 = arith.negf %16 : vector<8x1xf32>
    %18 = math.exp %17 : vector<8x1xf32>
    %cst_11 = arith.constant 1.000000e+00 : f32
    %19 = vector.broadcast %cst_11 : f32 to vector<8x1xf32>
    %20 = arith.addf %19, %18 : vector<8x1xf32>
    %21 = arith.divf %19, %20 : vector<8x1xf32>
    %c0_12 = arith.constant 0 : index
    %c0_13 = arith.constant 0 : index
    %22 = vector.load %arg6[%c0_12, %c0_13] : memref<8x1xf32, #tpu.memory_space<vmem>>, vector<8x1xf32>
    tpu.vector_store %arg6[%c0_12, %c0_13], %21 {strides = array<i32>} : memref<8x1xf32, #tpu.memory_space<vmem>>, vector<8x1xf32>,
    return
  }
  func.func @transform_0(%arg0: i32) -> (i32, i32) {
    %c0_i32 = arith.constant 0 : i32
    %c0_i32_0 = arith.constant 0 : i32
    return %arg0, %c0_i32 : i32, i32
  }
  func.func @transform_1(%arg0: i32) -> (i32, i32) {
    %c0_i32 = arith.constant 0 : i32
    %c0_i32_0 = arith.constant 0 : i32
    %c0_i32_1 = arith.constant 0 : i32
    return %c0_i32, %c0_i32_0 : i32, i32
  }
  func.func @transform_2(%arg0: i32) -> (i32, i32) {
    %c0_i32 = arith.constant 0 : i32
    %c0_i32_0 = arith.constant 0 : i32
    %c0_i32_1 = arith.constant 0 : i32
    return %c0_i32, %c0_i32_0 : i32, i32
  }
  func.func @transform_3(%arg0: i32) -> (i32, i32) {
    %c0_i32 = arith.constant 0 : i32
    %c0_i32_0 = arith.constant 0 : i32
    %c0_i32_1 = arith.constant 0 : i32
    return %c0_i32, %c0_i32_0 : i32, i32
  }
  func.func @transform_4(%arg0: i32) -> (i32, i32) {
    %c0_i32 = arith.constant 0 : i32
    %c0_i32_0 = arith.constant 0 : i32
    %c0_i32_1 = arith.constant 0 : i32
    return %c0_i32, %c0_i32_0 : i32, i32
  }
  func.func @transform_5(%arg0: i32) -> (i32, i32) {
    %c0_i32 = arith.constant 0 : i32
    %c0_i32_0 = arith.constant 0 : i32
    return %arg0, %c0_i32 : i32, i32
  }
}

</mosaic_0001>

<bundles_post_ra>
// kernel: tpu_custom_call.1
= control target key start
LH: loop header
LB: loop body
LE: loop exit
PB: predicated region body
PF: predicated region fallthrough
CT: control target
= control target key end

     0   :  { %11 = vsyncpa [#allocation4], 0  ;;  %s366_s0 = inlined_call_operand.hbm [shape: f32[8,104], index: 0, kind: input, shape index: {}]   ;;  %s367_s1 = inlined_call_operand.hbm [shape: bf16[104,128], index: 1, kind: input, shape index: {}]   ;;  %s368_s2 = inlined_call_operand.vmem [shape: f32[1,128], index: 2, kind: input, shape index: {}]   ;;  %s369_s3 = inlined_call_operand.vmem [shape: f32[1,128], index: 3, kind: input, shape index: {}]   ;;  %s370_s4 = inlined_call_operand.<no memory space> [shape: f32[1,1], index: 4, kind: input, shape index: {}]   ;;  %s371_s5 = inlined_call_operand.vmem [shape: f32[8,1], index: 5, kind: output, shape index: {}]  }
   0x1   :  { %12 = vsyncpa [#allocation6], 0  ;;  %s287_s18 = smov [#allocation3]   ;;  %s288_s20 = smov [#allocation5]  }
   0x2   :  { %s19_s19 = sshll.u32 %s287_s18, 4  ;;  %s28_s21 = sshll.u32 %s288_s20, 4  ;;  %s20_s19 = int_to_ptr.vmem [resolvable:$true] %s19_s19  ;;  %s323_s21 = int_to_ptr.vmem [resolvable:$true] %s28_s21 }
   0x3   :  { %s239_s24 = scalar_lea.hbm %s366_s0, 128 }
   0x4   :  { %p240_p0 = scmp.ne.s32.totalorder %s366_s0, %s239_s24  ;;  %p243_p1 = scmp.lt.u32.totalorder %s239_s24, %s366_s0 }
   0x6   :  { %p245_p2 = pnand %p243_p1, %p240_p0 }
   0x8   :  { %248 = shalt.err (!%p245_p2)
}
   0x9   :  { %s249_s29 = scalar_lea.vmem %s20_s19, 128  ;;  %p254_p4 = scmp.lt.s32.totalorder %s20_s19, %s20_s19 }
   0xa   :  { %p250_p3 = scmp.ne.s32.totalorder %s20_s19, %s249_s29  ;;  %p255_p5 = scmp.lt.s32.totalorder %s249_s29, %s249_s29 }
   0xc   :  { %p256_p6 = por %p255_p5, %p254_p4 }
   0xe   :  { %p257_p7 = pnand %p256_p6, %p250_p3 }
  0x10   :  { %260 = shalt.err (!%p257_p7)
}
  0x11   :  { %22 = dma.hbm_to_vmem [thread:$0]  %s366_s0, 128, %s20_s19, [#allocation4]  }
  0x12   :  { %s261_s9 = scalar_lea.hbm %s367_s1, 832 }
  0x13   :  { %p262_p8 = scmp.ne.s32.totalorder %s367_s1, %s261_s9  ;;  %p265_p9 = scmp.lt.u32.totalorder %s261_s9, %s367_s1 }
  0x15   :  { %p267_p10 = pnand %p265_p9, %p262_p8 }
  0x17   :  { %270 = shalt.err (!%p267_p10)
}
  0x18   :  { %s271_s14 = scalar_lea.vmem %s323_s21, 832  ;;  %p276_p12 = scmp.lt.s32.totalorder %s323_s21, %s323_s21 }
  0x19   :  { %p272_p11 = scmp.ne.s32.totalorder %s323_s21, %s271_s14  ;;  %p277_p13 = scmp.lt.s32.totalorder %s271_s14, %s271_s14 }
  0x1b   :  { %p278_p0 = por %p277_p13, %p276_p12 }
  0x1d   :  { %p279_p1 = pnand %p278_p0, %p272_p11 }
  0x1f   :  { %282 = shalt.err (!%p279_p1)
}
  0x20   :  { %s289_s0 = smov 64   ;;  %s290_s15 = smov 4  }
  0x21   :  { %34 = dma.hbm_to_vmem [thread:$0]  %s367_s1, 832, %s323_s21, [#allocation6], %s289_s0, %s289_s0, %s290_s15  }
  0x22   :  { %283 = dma.done.wait [#allocation4], 128  }
  0x23   :  { %284 = vsyncadd [#allocation4], 4294967168 }
  0x24   :  { %285 = dma.done.wait [#allocation6], 832  }
  0x25   :  { %286 = vsyncadd [#allocation6], 4294966464  ;;  %v291_v0 = vmov 0.0   ;;  %vm292_vm0 = vmmov 0   ;;  %v228_v1 = vld [vmem:[#allocation5] sm:$0xff]   ;;  %v229_v2 = vld [vmem:[#allocation5 + $0x8] sm:$0xff]   ;;  %v169_v20 = vstv %s370_s4 }
  0x26   :  { %204 = vmatprep.subr.bf16.mxu0 %v291_v0  ;;  %218 = vmatprep.mubr.msk.bf16.mxu0 %vm292_vm0, %v291_v0  ;;  %v230_v3 = vld [vmem:[#allocation5 + $0x10] sm:$0xff]   ;;  %v231_v4 = vld [vmem:[#allocation5 + $0x18] sm:$0xff]   ;;  %v232_v5 = vld [vmem:[#allocation5 + $0x20] sm:$0xff]   ;;  %vm113_vm1 = vcmask 1043456   ;;  %vm109_vm2 = vcmask 850944   ;;  %vm177_vm3 = vcmask 7168  }
  0x27   :  { %205 = vmatpush3.bf16.msra.mxu0 %v228_v1  ;;  %v233_v6 = vld [vmem:[#allocation5 + $0x28] sm:$0xff]   ;;  %v234_v7 = vld [vmem:[#allocation5 + $0x30] ss:$0 sps:$4 sm:$0xff]   ;;  %v48_v8 = vld [vmem:[#allocation3] sm:$0xff] }
  0x28   :  { %206 = vmatprep.subr.bf16.mxu0 %v291_v0  ;;  %v115_v9 = vsel %vm113_vm1, %v234_v7, 0  ;;  %v49_v10 = vpack.c.bf16 %v48_v8, %v48_v8  ;;  %v185_v11 = vld [vmem:[%s368_s2] ss:$0 sm:$0xff] }
  0x29   :  { %v194_v16 = vld [vmem:[%s369_s3] ss:$0 sm:$0xff] }
  0x2b   :  { %207 = vmatpush3.bf16.msra.mxu0 %v229_v2 }
  0x2c   :  { %208 = vmatprep.subr.bf16.mxu0 %v291_v0 }
  0x2f   :  { %209 = vmatpush3.bf16.msra.mxu0 %v230_v3 }
  0x30   :  { %210 = vmatprep.subr.bf16.mxu0 %v291_v0 }
  0x33   :  { %211 = vmatpush3.bf16.msra.mxu0 %v231_v4 }
  0x34   :  { %212 = vmatprep.subr.bf16.mxu0 %v291_v0 }
  0x37   :  { %213 = vmatpush3.bf16.msra.mxu0 %v232_v5 }
  0x38   :  { %214 = vmatprep.subr.bf16.mxu0 %v291_v0 }
  0x3b   :  { %215 = vmatpush3.bf16.msra.mxu0 %v233_v6 }
  0x3c   :  { %216 = vmatprep.subr.bf16.mxu0 %v291_v0 }
  0x3f   :  { %217 = vmatpush3.bf16.msra.mxu0 %v115_v9 }
  0x42   :  { %219 = vmatmul.mubr.msk.bf16.vlgmr.msra.gmra.mrb[0].mxu0 %vm109_vm2, %v49_v10 }
 0x115   :  { %v151_v12 = vpop.f32.mrb[0].mxu0 }
 0x116   :  { %v152_v13 = vadd.f32 %v185_v11, %v151_v12  ;;  %v220_v14 = vpop.f32.mrb[1].mxu0 }
 0x117   :  { %v154_v15 = vpop.f32.mrb[2].mxu0 }
 0x118   :  { %v157_v17 = vmax.f32 %v152_v13, 0.0  ;;  %v221_v18 = vpop.f32.mrb[3].mxu0 }
 0x11a   :  { %v165_v19 = vmul.f32 %v194_v16, %v157_v17 }
 0x11c   :  { %166 = vadd.xlane.f32.xlu0 %v165_v19 }
 0x1a9   :  { %v167_v21 = vpop.xlane.xlu0 %166 }
 0x1aa   :  { %v170_v22 = vadd.f32 %v169_v20, %v167_v21 }
 0x1ac   :  { %v195_v23 = vmul.f32 -1.442695, %v170_v22 }
 0x1ae   :  { %235 = vpow2.f32 %v195_v23 }
 0x1b8   :  { %v236_v24 = vpop.eup %235 }
 0x1b9   :  { %v174_v25 = vadd.f32 1.0, %v236_v24 }
 0x1bb   :  { %237 = vrcp.f32 %v174_v25 }
 0x1c5   :  { %v238_v26 = vpop.eup %237 }
 0x1c6   :  { %178 = vst.msk [vmem:[%s371_s5] sm:$0xff] %vm177_vm3, %v238_v26 }
 0x1c7   :  { %183 = vsyncpa [#allocation4], 1 }
 0x1c8   :  { %184 = vsyncpa [#allocation6], 1 }

</bundles_post_ra>
